<compile_context>
chip_gen: v7x
topology: tpu7x:2x2x1
jax: 0.10.0
libtpu: 0.0.40
codegen_flags: <defaults>
</compile_context>

<pallas_src>
import functools

import jax
import jax.numpy as jnp
from jax.experimental import pallas as pl
from jax.experimental.pallas import tpu as pltpu

_MiB = 1024 * 1024


def sge1d_kernel(x_ref, wb_ref, o_ref, *, h_axis, c_axis):
    # x_ref block: (Nt, Cg, H) or (Nt, H, Cg); wb_ref: (Nt, 1, 2) = [weight, bias].
    x = x_ref[...].astype(jnp.float32)
    h = x.shape[h_axis]

    # AdaptiveAvgPool1d(1): mean over the spatial (H) axis.
    avg = jnp.mean(x, axis=h_axis, keepdims=True)

    # xn = sum over the per-group channel axis of (x * avg).
    xn = jnp.sum(x * avg, axis=c_axis, keepdims=True)
    # `x` is dead from here on; the gating multiply re-reads x_ref below.

    # Normalize over H: subtract mean, divide by unbiased std (torch default,
    # ddof=1), eps added after the sqrt, exactly as in the PyTorch module.
    mean_t = jnp.mean(xn, axis=h_axis, keepdims=True)
    t = xn - mean_t
    var = jnp.sum(t * t, axis=h_axis, keepdims=True) * (1.0 / (h - 1))
    inv_std = pl.reciprocal(jnp.sqrt(var) + 1e-5, approx=False)  # tiny tensor

    wb = wb_ref[...]                      # (Nt, 1, 2) fp32
    w = wb[:, :, 0:1]                     # (Nt, 1, 1)
    b = wb[:, :, 1:2]                     # (Nt, 1, 1)
    t = (t * inv_std) * w + b

    gate = jax.nn.sigmoid(t)
    o_ref[...] = (x_ref[...].astype(jnp.float32) * gate).astype(o_ref.dtype)


def _round_up(v, m):
    return ((v + m - 1) // m) * m


def _tpu_vmem_capacity_bytes():
    """Best-effort per-core VMEM capacity; conservative 64 MiB fallback."""
    try:
        info = pltpu.get_tpu_info()
        for attr in ("vmem_capacity_bytes", "vmem_bytes", "vmem_size_bytes"):
            v = getattr(info, attr, None)
            if v:
                return int(v)
    except Exception:
        pass
    return 64 * _MiB  # safest assumption (v7x per-TC); also fine on v5e/v6e


def _plan_tiling(n, d0, d1, itemsize):
    """Pick the per-step group count `nt` and vmem_limit_bytes.

    d0, d1 are the (sublane, lane) dims of one group slab as laid out in the
    kernel.  The per-row working set counts the double-buffered in/out blocks
    plus the fp32 upcast temporaries.
    """
    vmem_cap = _tpu_vmem_capacity_bytes()
    if vmem_cap <= 64 * _MiB:
        # v7x-class: 64 MiB per TensorCore, 2 TCs -> keep the step count even.
        raw_block_cap = 5 * _MiB
        vmem_limit_cap = 48 * _MiB
        prefer_even_steps = True
    else:
        # v5e / v6e: 128 MiB physical VMEM, single TensorCore.
        raw_block_cap = 12 * _MiB
        vmem_limit_cap = 96 * _MiB
        prefer_even_steps = False

    # VMEM-padded bytes of one (d0, d1) slab in input dtype and in fp32.
    sub_mult = max(8, 32 // max(1, itemsize))        # 8 (f32), 16 (bf16), 32 (i8)
    slab_in = _round_up(d0, sub_mult) * _round_up(d1, 128) * itemsize
    slab_f32 = _round_up(d0, 8) * _round_up(d1, 128) * 4
    # 2x double-buffered input + 2x double-buffered output + ~4 fp32 temps.
    per_row_ws = 4 * slab_in + 4 * slab_f32

    usable = vmem_limit_cap - 4 * _MiB
    nt = max(1, min(n, usable // per_row_ws, max(1, raw_block_cap // slab_in)))

    if prefer_even_steps and n > 1:
        steps = pl.cdiv(n, nt)
        if steps == 1:
            nt = pl.cdiv(n, 2)
        elif steps % 2 == 1:
            # Shrink nt slightly (bounded search) to reach an even step count.
            for cand in range(nt, max(0, nt - 64), -1):
                if pl.cdiv(n, cand) % 2 == 0:
                    nt = cand
                    break

    vmem_limit = int(min(vmem_limit_cap,
                         max(32 * _MiB, nt * per_row_ws + 4 * _MiB)))
    return nt, vmem_limit


def spatial_group_enhance_1d(x, weight, bias, groups, max_group_tile=None):
    """x: (B, C, H); weight/bias: (1, groups, 1).  Matches the PyTorch forward."""
    b, c, h = x.shape
    assert c % groups == 0, "channels must be divisible by groups"
    assert h > 1, "H must be > 1 (unbiased std uses ddof=1)"
    cg = c // groups
    n = b * groups

    xg = x.reshape(n, cg, h)

    # Lane-dense layout for small H: present the slab channels-last so the
    # output stores are full-lane (unmasked) vst.
    channels_last = (h < 128) and (cg >= 128)
    if channels_last:
        xg = jnp.swapaxes(xg, 1, 2)        # (N, H, Cg)
        d0, d1 = h, cg
        h_axis, c_axis = 1, 2
    else:
        d0, d1 = cg, h
        h_axis, c_axis = 2, 1

    # Per flattened row n_idx = b_idx*groups + g_idx the group is n_idx % groups.
    # Fold weight & bias into one (N, 1, 2) fp32 tensor (single tiny DMA/step).
    w_flat = jnp.tile(weight.reshape(groups), b)
    b_flat = jnp.tile(bias.reshape(groups), b)
    wb = jnp.stack([w_flat, b_flat], axis=-1).reshape(n, 1, 2).astype(jnp.float32)

    itemsize = jnp.dtype(x.dtype).itemsize
    nt, vmem_limit = _plan_tiling(n, d0, d1, itemsize)
    if max_group_tile is not None:         # test/override knob
        nt = max(1, min(nt, int(max_group_tile)))
    grid = (pl.cdiv(n, nt),)               # ragged last block is masked by Pallas

    kernel = functools.partial(sge1d_kernel, h_axis=h_axis, c_axis=c_axis)

    cost = pl.CostEstimate(
        flops=6 * n * cg * h,
        transcendentals=n * h,
        bytes_accessed=2 * n * cg * h * itemsize + n * 2 * 4,
    )

    out = pl.pallas_call(
        kernel,
        out_shape=jax.ShapeDtypeStruct((n, d0, d1), x.dtype),
        grid=grid,
        in_specs=[
            pl.BlockSpec((nt, d0, d1), lambda i: (i, 0, 0)),
            pl.BlockSpec((nt, 1, 2), lambda i: (i, 0, 0)),
        ],
        out_specs=pl.BlockSpec((nt, d0, d1), lambda i: (i, 0, 0)),
        compiler_params=pltpu.CompilerParams(
            dimension_semantics=("parallel",),
            vmem_limit_bytes=vmem_limit,
        ),
        cost_estimate=cost,
    )(xg, wb)

    if channels_last:
        out = jnp.swapaxes(out, 1, 2)
    return out.reshape(b, c, h)


def ref_forward(x, weight, bias, groups):
    """Pure-JAX reference mirroring the PyTorch forward exactly."""
    b, c, h = x.shape
    xg = x.reshape(b * groups, -1, h)
    avg = jnp.mean(xg, axis=-1, keepdims=True)
    xn = jnp.sum(xg * avg, axis=1, keepdims=True)
    t = xn.reshape(b * groups, h)
    t = t - jnp.mean(t, axis=1, keepdims=True)
    std = jnp.std(t, axis=1, keepdims=True, ddof=1) + 1e-5
    t = t / std
    t = t.reshape(b, groups, h)
    t = t * weight + bias
    t = t.reshape(b * groups, 1, h)
    xg = xg * jax.nn.sigmoid(t)
    return xg.reshape(b, c, h)


if __name__ == "__main__":
    key = jax.random.PRNGKey(0)
    k1, k2, k3, k4 = jax.random.split(key, 4)

    # Case 1: module init params (weight = zeros, bias = ones), small Cg.
    B, C, H, G = 2, 8, 16, 4
    x = jax.random.normal(k1, (B, C, H), dtype=jnp.float32)
    w0 = jnp.zeros((1, G, 1), jnp.float32)
    b0 = jnp.ones((1, G, 1), jnp.float32)
    out = jax.block_until_ready(spatial_group_enhance_1d(x, w0, b0, G))
    ref = ref_forward(x, w0, b0, G)
    if not jnp.allclose(out, ref, atol=1e-5, rtol=1e-5):
        raise AssertionError("Pallas kernel mismatch vs reference (init params)")

    # Case 2: random affine params on the same shape.
    w1 = jax.random.normal(k2, (1, G, 1), dtype=jnp.float32)
    b1 = jax.random.normal(k3, (1, G, 1), dtype=jnp.float32)
    out = jax.block_until_ready(spatial_group_enhance_1d(x, w1, b1, G))
    ref = ref_forward(x, w1, b1, G)
    if not jnp.allclose(out, ref, atol=1e-5, rtol=1e-5):
        raise AssertionError("Pallas kernel mismatch vs reference (random params)")

    # Case 3: force a ragged grid (nt=3 does not divide N=8) to exercise the
    # masked last block.
    out = jax.block_until_ready(
        spatial_group_enhance_1d(x, w1, b1, G, max_group_tile=3))
    if not jnp.allclose(out, ref, atol=1e-5, rtol=1e-5):
        raise AssertionError("Pallas kernel mismatch vs reference (ragged grid)")

    # Case 4: Cg >= 128 > H exercises the lane-dense (channels-last) path.
    B2, C2, H2, G2 = 2, 256, 16, 2
    x2 = jax.random.normal(k4, (B2, C2, H2), dtype=jnp.float32)
    w2 = jax.random.normal(k2, (1, G2, 1), dtype=jnp.float32)
    b2 = jax.random.normal(k3, (1, G2, 1), dtype=jnp.float32)
    out2 = jax.block_until_ready(spatial_group_enhance_1d(x2, w2, b2, G2))
    ref2 = ref_forward(x2, w2, b2, G2)
    if not jnp.allclose(out2, ref2, atol=1e-5, rtol=1e-5):
        raise AssertionError("Pallas kernel mismatch vs reference (lane-dense path)")

    print("KERNEL_OK")
</pallas_src>

<mosaic_0001>
module attributes {stable_mosaic.version = 11 : i64} {
  func.func @sge1d_kernel(%arg0: i32, %arg1: memref<4x2x16xf32, #tpu.memory_space<vmem>>, %arg2: memref<4x1x2xf32, #tpu.memory_space<vmem>>, %arg3: memref<4x2x16xf32, #tpu.memory_space<vmem>>) attributes {dimension_semantics = [#tpu.dimension_semantics<parallel>], iteration_bounds = array<i64: 2>, scalar_prefetch = 0 : i64, scratch_operands = 0 : i64, tpu.core_type = #tpu.core_type<tc>, window_params = [{transform_indices = @transform_0, window_bounds = array<i64: 4, 2, 16>}, {transform_indices = @transform_1, window_bounds = array<i64: 4, 1, 2>}, {transform_indices = @transform_2, window_bounds = array<i64: 4, 2, 16>}]} {
    %c0 = arith.constant 0 : index
    %c0_0 = arith.constant 0 : index
    %c0_1 = arith.constant 0 : index
    %0 = vector.load %arg1[%c0, %c0_0, %c0_1] : memref<4x2x16xf32, #tpu.memory_space<vmem>>, vector<4x2x16xf32>
    %cst = arith.constant dense<0.000000e+00> : vector<4x2xf32>
    %1 = vector.multi_reduction <add>, %0, %cst [2] : vector<4x2x16xf32> to vector<4x2xf32>
    %2 = vector.shape_cast %1 : vector<4x2xf32> to vector<4x2x1xf32>
    %cst_2 = arith.constant 1.600000e+01 : f32
    %3 = vector.broadcast %cst_2 : f32 to vector<4x2x1xf32>
    %4 = arith.divf %2, %3 : vector<4x2x1xf32>
    %5 = vector.broadcast %4 : vector<4x2x1xf32> to vector<4x2x16xf32>
    %6 = arith.mulf %0, %5 : vector<4x2x16xf32>
    %cst_3 = arith.constant dense<0.000000e+00> : vector<4x16xf32>
    %7 = vector.multi_reduction <add>, %6, %cst_3 [1] : vector<4x2x16xf32> to vector<4x16xf32>
    %8 = vector.shape_cast %7 : vector<4x16xf32> to vector<4x1x16xf32>
    %cst_4 = arith.constant dense<0.000000e+00> : vector<4x1xf32>
    %9 = vector.multi_reduction <add>, %8, %cst_4 [2] : vector<4x1x16xf32> to vector<4x1xf32>
    %10 = vector.shape_cast %9 : vector<4x1xf32> to vector<4x1x1xf32>
    %cst_5 = arith.constant 1.600000e+01 : f32
    %11 = vector.broadcast %cst_5 : f32 to vector<4x1x1xf32>
    %12 = arith.divf %10, %11 : vector<4x1x1xf32>
    %13 = vector.broadcast %12 : vector<4x1x1xf32> to vector<4x1x16xf32>
    %14 = arith.subf %8, %13 : vector<4x1x16xf32>
    %15 = arith.mulf %14, %14 : vector<4x1x16xf32>
    %cst_6 = arith.constant dense<0.000000e+00> : vector<4x1xf32>
    %16 = vector.multi_reduction <add>, %15, %cst_6 [2] : vector<4x1x16xf32> to vector<4x1xf32>
    %17 = vector.shape_cast %16 : vector<4x1xf32> to vector<4x1x1xf32>
    %cst_7 = arith.constant 0.0666666701 : f32
    %18 = vector.broadcast %cst_7 : f32 to vector<4x1x1xf32>
    %19 = arith.mulf %17, %18 : vector<4x1x1xf32>
    %20 = math.sqrt %19 : vector<4x1x1xf32>
    %cst_8 = arith.constant 9.99999974E-6 : f32
    %21 = vector.broadcast %cst_8 : f32 to vector<4x1x1xf32>
    %22 = arith.addf %20, %21 : vector<4x1x1xf32>
    %23 = tpu.reciprocal %22 : vector<4x1x1xf32> -> vector<4x1x1xf32>
    %c0_9 = arith.constant 0 : index
    %c0_10 = arith.constant 0 : index
    %c0_11 = arith.constant 0 : index
    %24 = vector.load %arg2[%c0_9, %c0_10, %c0_11] : memref<4x1x2xf32, #tpu.memory_space<vmem>>, vector<4x1x2xf32>
    %25 = vector.extract_strided_slice %24 {offsets = [0, 0, 0], sizes = [4, 1, 1], strides = [1, 1, 1]} : vector<4x1x2xf32> to vector<4x1x1xf32>
    %26 = vector.extract_strided_slice %24 {offsets = [0, 0, 1], sizes = [4, 1, 1], strides = [1, 1, 1]} : vector<4x1x2xf32> to vector<4x1x1xf32>
    %27 = vector.broadcast %23 : vector<4x1x1xf32> to vector<4x1x16xf32>
    %28 = arith.mulf %14, %27 : vector<4x1x16xf32>
    %29 = vector.broadcast %25 : vector<4x1x1xf32> to vector<4x1x16xf32>
    %30 = arith.mulf %28, %29 : vector<4x1x16xf32>
    %31 = vector.broadcast %26 : vector<4x1x1xf32> to vector<4x1x16xf32>
    %32 = arith.addf %30, %31 : vector<4x1x16xf32>
    %33 = arith.negf %32 : vector<4x1x16xf32>
    %34 = math.exp %33 : vector<4x1x16xf32>
    %cst_12 = arith.constant 1.000000e+00 : f32
    %35 = vector.broadcast %cst_12 : f32 to vector<4x1x16xf32>
    %36 = arith.addf %35, %34 : vector<4x1x16xf32>
    %37 = arith.divf %35, %36 : vector<4x1x16xf32>
    %c0_13 = arith.constant 0 : index
    %c0_14 = arith.constant 0 : index
    %c0_15 = arith.constant 0 : index
    %38 = vector.load %arg1[%c0_13, %c0_14, %c0_15] : memref<4x2x16xf32, #tpu.memory_space<vmem>>, vector<4x2x16xf32>
    %39 = vector.broadcast %37 : vector<4x1x16xf32> to vector<4x2x16xf32>
    %40 = arith.mulf %38, %39 : vector<4x2x16xf32>
    %c0_16 = arith.constant 0 : index
    %c0_17 = arith.constant 0 : index
    %c0_18 = arith.constant 0 : index
    %41 = vector.load %arg3[%c0_16, %c0_17, %c0_18] : memref<4x2x16xf32, #tpu.memory_space<vmem>>, vector<4x2x16xf32>
    tpu.vector_store %arg3[%c0_16, %c0_17, %c0_18], %40 {strides = array<i32>} : memref<4x2x16xf32, #tpu.memory_space<vmem>>, vector<4x2x16xf32>,
    return
  }
  func.func @transform_0(%arg0: i32) -> (i32, i32, i32) {
    %c0_i32 = arith.constant 0 : i32
    %c0_i32_0 = arith.constant 0 : i32
    %c0_i32_1 = arith.constant 0 : i32
    return %arg0, %c0_i32, %c0_i32_0 : i32, i32, i32
  }
  func.func @transform_1(%arg0: i32) -> (i32, i32, i32) {
    %c0_i32 = arith.constant 0 : i32
    %c0_i32_0 = arith.constant 0 : i32
    %c0_i32_1 = arith.constant 0 : i32
    return %arg0, %c0_i32, %c0_i32_0 : i32, i32, i32
  }
  func.func @transform_2(%arg0: i32) -> (i32, i32, i32) {
    %c0_i32 = arith.constant 0 : i32
    %c0_i32_0 = arith.constant 0 : i32
    %c0_i32_1 = arith.constant 0 : i32
    return %arg0, %c0_i32, %c0_i32_0 : i32, i32, i32
  }
}

</mosaic_0001>

<bundles_post_ra>
// kernel: tpu_custom_call.1
= control target key start
LH: loop header
LB: loop body
LE: loop exit
PB: predicated region body
PF: predicated region fallthrough
CT: control target
= control target key end

     0   :  { %7 = vsyncpa [#allocation3], 0  ;;  %s1009_s0 = inlined_call_operand.hbm [shape: f32[8,2,16], index: 0, kind: input, shape index: {}]   ;;  %s1010_s1 = inlined_call_operand.vmem [shape: f32[8,1,2], index: 1, kind: input, shape index: {}]   ;;  %s1011_s2 = inlined_call_operand.hbm [shape: f32[8,2,16], index: 2, kind: output, shape index: {}]  }
   0x1   :  { %9 = vsyncpa [#allocation3 + $0x1], 0 }
   0x2   :  { %10 = vsyncpa [#allocation4], 0 }
   0x3   :  { %12 = vsyncpa [#allocation4 + $0x1], 0  ;;  %s756_s9 = smov 0   ;;  %s758_s10 = smov 0  }
   0x4   :  { %s760_s11 = smov 0   ;;  %s762_s12 = smov 0  }
   0x5 LB: > { %s777_s13 = sadd.s32 4294967295, %s731_s12   ;;  %s526_s14 = sadd.s32 4294967294, %s731_s12   ;;  %s731_s12 = sphi %s762_s12, %s1024_s12   ;;  %s727_s11 = sphi %s760_s11, %s1023_s11   ;;  %s723_s10 = sphi %s758_s10, %s1022_s10   ;;  %s719_s9 = sphi %s756_s9, %s1021_s9  }
   0x6   : > { %s781_s15 = sadd.s32 1, %s731_s12   ;;  %s25_s16 = sadd.s32 1, %s727_s11 }
   0x7   : > { %s22_s17 = ssub.s32 %s731_s12, %s781_s15  ;;  %p32_p0 = scmp.ne.s32.totalorder %s727_s11, %s723_s10 }
   0x8   : > { %p23_p1 = scmp.eq.s32.totalorder %s22_s17, 0  ;;  %p33_p2 = scmp.eq.s32.totalorder %s731_s12, 0 }
   0x9   : > { %p38_p3 = scmp.ne.s32.totalorder %s723_s10, %s719_s9  ;;  %p39_p4 = scmp.eq.s32.totalorder %s777_s13, 0 }
   0xa   : > { %s793_s18 = scalar_select %p23_p1, %s727_s11, %s25_s16  }
   0xb   : > { %p795_p5 = por %p33_p2, %p32_p0  ;;  %p799_p6 = por %p39_p4, %p38_p3 }
   0xc   : > { %p88_p7 = scmp.eq.s32.totalorder %s777_s13, 1  ;;  %p94_p8 = scmp.eq.s32.totalorder %s526_s14, 1 }
   0xd   : > { %p559_p10 = scmp.lt.s32.totalorder %s731_s12, 2  ;;  %s114_s23 = sand.u32 1, %s727_s11  }
   0xe   : > { %p806_p11 = por %p88_p7, %p32_p0  ;;  %p810_p12 = por %p94_p8, %p38_p3 }
   0xf   : > { %s545_s24 = sshll.u32 %s731_s12, 7  ;;  %s529_s25 = sshll.u32 %s114_s23, 3 }
  0x10   : > { %s1015_s21 = scalar_select %p806_p11, 1, 0 }
  0x11   : > { %s1016_s22 = scalar_select %p810_p12, 1, 0 }
  0x12   : > { %s819_s28 = scalar_lea.hbm %s1009_s0, %s545_s24  ;;  %s118_s29 = scalar_lea.vmem [#allocation2], %s529_s25 }
  0x13   : > { %s125_s30 = sshll.u32 %s118_s29, 4  ;;  %p823_p13 = pnand %p559_p10, %p795_p5  ;;  %s827_s30 = int_to_ptr.vmem [resolvable:$true] %s125_s30 }
  0x14   : > { %s829_s4 = scalar_lea.sflag [#allocation3], %s114_s23  ;;  %s635_s5 = scalar_lea.hbm %s819_s28, 128 }
  0x15   : > { %p636_p0 = scmp.ne.s32.totalorder %s819_s28, %s635_s5  ;;  %p637_p1 = pneg %p823_p13 }
  0x16   : > { %s640_s8 = scalar_lea.hbm %s1009_s0, 256  ;;  %p641_p4 = scmp.lt.u32.totalorder %s819_s28, %s1009_s0 }
  0x17   : > { %p638_p2 = pnand %p637_p1, %p636_p0  ;;  %p642_p5 = scmp.lt.u32.totalorder %s640_s8, %s635_s5 }
  0x18   : > { %p644_p8 = scmp.lt.u32.totalorder %s635_s5, %s819_s28 }
  0x19   : > { %p639_p3 = pneg %p638_p2  ;;  %p643_p7 = por %p642_p5, %p641_p4 }
  0x1b   : > { %p645_p10 = por %p644_p8, %p643_p7 }
  0x1d   : > { %p646_p9 = pnand %p645_p10, %p639_p3 }
  0x1f   : > { %649 = shalt.err (!%p646_p9)
}
  0x20   : > { %s650_s17 = scalar_lea.vmem %s827_s30, 128  ;;  %s733_s19 = smov [#allocation2]  }
  0x21   : > { %p651_p0 = scmp.ne.s32.totalorder %s827_s30, %s650_s17  ;;  %s655_s23 = sshll.u32 %s733_s19, 4  ;;  %s656_s23 = int_to_ptr.vmem [resolvable:$false] %s655_s23 }
  0x22   : > { %s657_s24 = scalar_lea.vmem %s656_s23, 256  ;;  %p658_p11 = scmp.lt.s32.totalorder %s827_s30, %s656_s23 }
  0x23   : > { %p653_p2 = pnand %p651_p0, %p637_p1  ;;  %p659_p4 = scmp.lt.s32.totalorder %s657_s24, %s650_s17 }
  0x25   : > { %p654_p12 = pneg %p653_p2  ;;  %p660_p5 = por %p659_p4, %p658_p11 }
  0x27   : > { %p661_p7 = pnand %p660_p5, %p654_p12 }
  0x29   : > { %664 = shalt.err (!%p661_p7)
}
  0x2a   : > { %s734_s25 = smov 32   ;;  %s735_s26 = smov 2  }
  0x2b   : > { %554 = dma.hbm_to_vmem [thread:$0]  (!%p823_p13), %s819_s28, 128, %s827_s30, %s829_s4, %s734_s25, %s734_s25, %s735_s26  }
  0x2c   : > { %p532_p9 = scmp.ge.s32.totalorder %s731_s12, 1  ;;  %p141_p1 = scmp.lt.s32.totalorder %s731_s12, 3 }
  0x2e   : > { %p142_p3 = pnand %p532_p9, %p141_p1 }
  0x2f   : > { %s860_s27 = sand.u32 (!%p142_p3), 1, %s723_s10  }
  0x30   : > { %145 = sbr.rel (%p142_p3) target bundleno = 662 (0x296), region = 28  ;;  %s533_s29 = sshll.u32 (!%p142_p3), %s860_s27, 3 }
  0x31   : > { %s148_s5 = scalar_lea.sflag (!%p142_p3), [#allocation3], %s860_s27  ;;  %s151_s6 = scalar_lea.vmem (!%p142_p3), [#allocation2], %s533_s29 }
  0x37   : > { %710 = dma.done.wait (%p799_p6), %s148_s5, 128  }
  0x38   : > { %712 = vsyncadd (%p799_p6), %s148_s5, 4294967168  ;;  %vm187_vm0 = vcmask 123904   ;;  %v870_v0 = vld [vmem:[%s151_s6] sm:$0x3]  ;;  %v872_v1 = vld [vmem:[%s151_s6 + $0x4] sm:$0x3] }
  0x39   : > { %v874_v2 = vld [vmem:[%s151_s6 + $0x2] sm:$0x3]  ;;  %v188_v3 = vsel %vm187_vm0, %v870_v0, 0.0  ;;  %v194_v4 = vsel %vm187_vm0, %v872_v1, 0.0  ;;  %v880_v5 = vld [vmem:[%s151_s6 + $0x6] sm:$0x3] }
  0x3a   : > { %189 = vadd.xlane.f32.xlu0 %v188_v3  ;;  %195 = vadd.xlane.f32.xlu1 %v194_v4  ;;  %v191_v6 = vsel %vm187_vm0, %v874_v2, 0.0  ;;  %v197_v7 = vsel %vm187_vm0, %v880_v5, 0.0  ;;  %vm237_vm1 = vcmask 130048   ;;  %v736_v52 = vmov 0   ;;  %s535_s20 = sshll.u32 %s777_s13, 2  ;;  %s937_s4 = scalar_lea.vmem [#allocation5], %s533_s29 }
  0x3b   : > { %600 = vset.pattern.permute.xlu1 %v736_v52  ;;  %599 = vset.pattern.permute.xlu0 %v736_v52  ;;  %p178_p6 = scmp.lt.s32.totalorder %s535_s20, 7  ;;  %s546_s7 = sshll.u32 %s777_s13, 7 }
  0x3c   : > { %s444_s8 = sshll.u32 %s937_s4, 4  ;;  %s960_s17 = scalar_lea.hbm %s1011_s2, %s546_s7  ;;  %s962_s8 = int_to_ptr.vmem [resolvable:$true] %s444_s8 }
  0x3d   : > { %s1026_s20 = smov (!%p178_p6, %s535_s20), 7  ;;  %s431_s19 = scalar_lea.sflag [#allocation4], %s860_s27 }
  0x3e   : > { %192 = vadd.xlane.f32.xlu0 %v191_v6  ;;  %198 = vadd.xlane.f32.xlu1 %v197_v7  ;;  %s180_s3 = scalar_lea.vmem %s1010_s1, %s1026_s20  ;;  %s665_s23 = scalar_lea.vmem %s962_s8, 128 }
  0x3f   : > { %p666_p11 = scmp.ne.s32.totalorder %s962_s8, %s665_s23  ;;  %p1018_p12 = scmp.ne.s32.totalorder %s1015_s21, 0 }
  0x40   : > { %s738_s13 = smov [#allocation5]  }
  0x41   : > { %p667_p13 = pnand %p666_p11, %p1018_p12  ;;  %s669_s24 = sshll.u32 %s738_s13, 4  ;;  %s670_s24 = int_to_ptr.vmem [resolvable:$false] %s669_s24 }
  0x42   : > { %s671_s25 = scalar_lea.vmem %s670_s24, 256  ;;  %p672_p10 = scmp.lt.s32.totalorder %s962_s8, %s670_s24 }
  0x43   : > { %p668_p8 = pneg %p667_p13  ;;  %p673_p0 = scmp.lt.s32.totalorder %s671_s25, %s665_s23 }
  0x45   : > { %p674_p2 = por %p673_p0, %p672_p10 }
  0x47   : > { %p675_p4 = pnand %p674_p2, %p668_p8 }
  0xc7   : > { %v190_v8 = vpop.xlane.xlu0 %189  ;;  %v196_v9 = vpop.xlane.xlu1 %195 }
  0xc8   : > { %v201_v10 = vmul.f32 0.0625, %v190_v8  ;;  %v203_v11 = vmul.f32 0.0625, %v196_v9  ;;  %v315_v8 = vld [vmem:[%s180_s3 + $0x1] sm:$0x1]  ;;  %v316_v9 = vld [vmem:[%s180_s3 + $0x2] sm:$0x1] }
  0xca   : > { %v205_v12 = vmul.f32 %v201_v10, %v870_v0  ;;  %v207_v13 = vmul.f32 %v203_v11, %v872_v1  ;;  %v314_v10 = vld [vmem:[%s180_s3] sm:$0x1]  ;;  %v317_v11 = vld [vmem:[%s180_s3 + $0x3] sm:$0x1] }
  0xcb   : > { %v193_v14 = vpop.xlane.xlu0 %192  ;;  %v199_v15 = vpop.xlane.xlu1 %198 }
  0xcc   : > { %v209_v16 = vsel %vm187_vm0, %v205_v12, 0.0  ;;  %v223_v17 = vsel %vm187_vm0, %v207_v13, 0.0  ;;  %v202_v18 = vmul.f32 0.0625, %v193_v14  ;;  %v204_v19 = vmul.f32 0.0625, %v199_v15 }
  0xcd   : > { %v210_v20 = vrot.slane %v209_v16, 4  ;;  %v224_v21 = vrot.slane %v223_v17, 4  ;;  %v737_v12 = vmov 1  }
  0xce   : > { %v206_v22 = vmul.f32 %v202_v18, %v874_v2  ;;  %v208_v23 = vmul.f32 %v204_v19, %v880_v5 }
  0xcf   : > { %v211_v24 = vadd.f32 %v210_v20, %v209_v16  ;;  %v225_v25 = vadd.f32 %v224_v21, %v223_v17 }
  0xd0   : > { %v216_v26 = vsel %vm187_vm0, %v206_v22, 0.0  ;;  %v230_v27 = vsel %vm187_vm0, %v208_v23, 0.0 }
  0xd1   : > { %v217_v28 = vrot.slane %v216_v26, 4  ;;  %v231_v29 = vrot.slane %v230_v27, 4  ;;  %v212_v30 = vrot.slane %v211_v24, 2  ;;  %v226_v31 = vrot.slane %v225_v25, 2 }
  0xd3   : > { %v218_v32 = vadd.f32 %v217_v28, %v216_v26  ;;  %v232_v33 = vadd.f32 %v231_v29, %v230_v27  ;;  %v213_v34 = vadd.f32 %v212_v30, %v211_v24  ;;  %v227_v35 = vadd.f32 %v226_v31, %v225_v25 }
  0xd5   : > { %v214_v36 = vrot.slane %v213_v34, 1  ;;  %v228_v37 = vrot.slane %v227_v35, 1  ;;  %v219_v38 = vrot.slane %v218_v32, 2  ;;  %v233_v39 = vrot.slane %v232_v33, 2 }
  0xd7   : > { %v215_v40 = vadd.f32 %v214_v36, %v213_v34  ;;  %v229_v41 = vadd.f32 %v228_v37, %v227_v35  ;;  %v220_v42 = vadd.f32 %v219_v38, %v218_v32  ;;  %v234_v43 = vadd.f32 %v233_v39, %v232_v33 }
  0xd8   : > { %v327_v33 = vlaneseq }
  0xd9   : > { %v238_v44 = vsel %vm237_vm1, %v215_v40, 0.0  ;;  %v221_v45 = vrot.slane %v220_v42, 1  ;;  %v235_v46 = vrot.slane %v234_v43, 1  ;;  %v244_v47 = vsel %vm237_vm1, %v229_v41, 0.0 }
  0xda   : > { %239 = vadd.xlane.f32.xlu0 %v238_v44  ;;  %v328_v39 = vshrl.u32 %v327_v33, 7 }
  0xdb   : > { %v222_v48 = vadd.f32 %v221_v45, %v220_v42  ;;  %v236_v49 = vadd.f32 %v235_v46, %v234_v43 }
  0xdd   : > { %v241_v50 = vsel %vm237_vm1, %v222_v48, 0.0  ;;  %v247_v51 = vsel %vm237_vm1, %v236_v49, 0.0 }
  0xde   : > { %245 = vadd.xlane.f32.xlu0 %v244_v47  ;;  %242 = vadd.xlane.f32.xlu1 %v241_v50 }
  0xe2   : > { %248 = vadd.xlane.f32.xlu1 %v247_v51 }
 0x167   : > { %v240_v53 = vpop.xlane.xlu0 %239 }
 0x168   : > { %v250_v54 = vmul.f32 0.0625, %v240_v53 }
 0x16a   : > { %v898_v55 = vsub.f32 %v215_v40, %v250_v54 }
 0x16b   : > { %v243_v56 = vpop.xlane.xlu1 %242  ;;  %v246_v57 = vpop.xlane.xlu0 %245 }
 0x16c   : > { %v251_v58 = vmul.f32 0.0625, %v243_v56  ;;  %v252_v59 = vmul.f32 0.0625, %v246_v57  ;;  %v258_v60 = vmul.f32 %v898_v55, %v898_v55 }
 0x16e   : > { %v902_v61 = vsub.f32 %v222_v48, %v251_v58  ;;  %v904_v62 = vsub.f32 %v229_v41, %v252_v59  ;;  %v262_v63 = vsel %vm237_vm1, %v258_v60, 0.0  ;;  %v926_v41 = vsub.s32 0, %v328_v39 }
 0x16f   : > { %263 = vadd.xlane.f32.xlu0 %v262_v63  ;;  %v249_v13 = vpop.xlane.xlu1 %248 }
 0x170   : > { %v259_v3 = vmul.f32 %v902_v61, %v902_v61  ;;  %v260_v4 = vmul.f32 %v904_v62, %v904_v62  ;;  %v253_v14 = vmul.f32 0.0625, %v249_v13 }
 0x172   : > { %v265_v6 = vsel %vm237_vm1, %v259_v3, 0.0  ;;  %v268_v7 = vsel %vm237_vm1, %v260_v4, 0.0  ;;  %v917_v15 = vsub.f32 %v236_v49, %v253_v14 }
 0x173   : > { %266 = vadd.xlane.f32.xlu1 %v265_v6  ;;  %269 = vadd.xlane.f32.xlu0 %v268_v7 }
 0x174   : > { %v261_v16 = vmul.f32 %v917_v15, %v917_v15 }
 0x176   : > { %v271_v17 = vsel %vm237_vm1, %v261_v16, 0.0 }
 0x184   : > { %333 = vperm.xlu1 %600, %v315_v8  }
 0x188   : > { %342 = vperm.xlu1 %600, %v316_v9  }
 0x189   : > { %324 = vperm.xlu0 %599, %v314_v10  }
 0x18c   : > { %351 = vperm.xlu1 %600, %v317_v11  }
 0x18d   : > { %602 = vset.pattern.permute.xlu0 %v737_v12 }
 0x190   : > { %601 = vset.pattern.permute.xlu1 %v737_v12 }
 0x191   : > { %363 = vperm.xlu1 %601, %v314_v10  }
 0x195   : > { %371 = vperm.xlu1 %601, %v315_v8  }
 0x1b9   : > { %272 = vadd.xlane.f32.xlu1 %v271_v17 }
 0x1ca   : > { %379 = vperm.xlu1 %601, %v316_v9  }
 0x1ce   : > { %387 = vperm.xlu1 %601, %v317_v11  }
 0x1fc   : > { %v264_v18 = vpop.xlane.xlu0 %263 }
 0x1fd   : > { %v274_v19 = vmul.f32 0.06666667, %v264_v18 }
 0x1ff   : > { %603 = vrsqrt.f32 %v274_v19  ;;  %vm280_vm2 = vcmp.eq.f32.partialorder %v274_v19, inf  ;;  %v283_v25 = vand.u32 2147483648, %v274_v19  ;;  %vm282_vm3 = vcmp.eq.f32.partialorder %v274_v19, 0.0 }
 0x200   : > { %v267_v20 = vpop.xlane.xlu1 %266  ;;  %v270_v36 = vpop.xlane.xlu0 %269 }
 0x201   : > { %v275_v21 = vmul.f32 0.06666667, %v267_v20  ;;  %v276_v45 = vmul.f32 0.06666667, %v270_v36 }
 0x203   : > { %605 = vrsqrt.f32 %v275_v21  ;;  %vm287_vm4 = vcmp.eq.f32.partialorder %v275_v21, inf  ;;  %v290_v32 = vand.u32 2147483648, %v275_v21  ;;  %vm289_vm5 = vcmp.eq.f32.partialorder %v275_v21, 0.0 }
 0x204   : > { %v334_v22 = vpop.permute.xlu1 %333  ;;  %vm294_vm6 = vcmp.eq.f32.partialorder %v276_v45, inf  ;;  %v297_v6 = vand.u32 2147483648, %v276_v45  ;;  %vm296_vm7 = vcmp.eq.f32.partialorder %v276_v45, 0.0 }
 0x205   : > { %v339_v52 = vrot.slane %v334_v22, %v926_v41 }
 0x208   : > { %v922_v26 = vpop.permute.xlu1 %342  ;;  %v325_v40 = vpop.permute.xlu0 %324 }
 0x209   : > { %v604_v23 = vpop.eup %603  ;;  %v330_v43 = vrot.slane %v325_v40, %v926_v41 }
 0x20a   : > { %v279_v24 = vmul.f32 %v604_v23, %v274_v19 }
 0x20c   : > { %v281_v27 = vsel %vm280_vm2, %v274_v19, %v279_v24  ;;  %v924_v38 = vpop.permute.xlu1 %351 }
 0x20d   : > { %v606_v28 = vpop.eup %605  ;;  %v284_v29 = vsel %vm282_vm3, %v283_v25, %v281_v27 }
 0x20e   : > { %v286_v30 = vmul.f32 %v606_v28, %v275_v21  ;;  %v306_v31 = vadd.f32 1e-05, %v284_v29 }
 0x210   : > { %v288_v34 = vsel %vm287_vm4, %v275_v21, %v286_v30  ;;  %607 = vrcp.f32 %v306_v31  ;;  %v364_v42 = vpop.permute.xlu1 %363 }
 0x211   : > { %v291_v35 = vsel %vm289_vm5, %v290_v32, %v288_v34  ;;  %v369_v47 = vrot.slane %v364_v42, %v926_v41  ;;  %v357_v32 = vrot.slane %v924_v38, %v926_v41 }
 0x212   : > { %v307_v37 = vadd.f32 1e-05, %v291_v35 }
 0x214   : > { %609 = vrcp.f32 %v307_v37  ;;  %v372_v50 = vpop.permute.xlu1 %371 }
 0x215   : > { %611 = vrsqrt.f32 %v276_v45  ;;  %v377_v56 = vrot.slane %v372_v50, %v926_v41 }
 0x21a   : > { %v608_v44 = vpop.eup %607 }
 0x21b   : > { %v318_v46 = vmul.f32 %v608_v44, %v898_v55 }
 0x21d   : > { %v358_v48 = vmul.f32 %v330_v43, %v318_v46 }
 0x21e   : > { %v610_v49 = vpop.eup %609 }
 0x21f   : > { %v319_v51 = vmul.f32 %v610_v49, %v902_v61  ;;  %v394_v53 = vadd.f32 %v369_v47, %v358_v48  ;;  %v612_v55 = vpop.eup %611 }
 0x220   : > { %v293_v60 = vmul.f32 %v612_v55, %v276_v45 }
 0x221   : > { %v359_v54 = vmul.f32 %v339_v52, %v319_v51  ;;  %v536_v57 = vmul.f32 -1.442695, %v394_v53 }
 0x222   : > { %v295_v4 = vsel %vm294_vm6, %v276_v45, %v293_v60 }
 0x223   : > { %v395_v58 = vadd.f32 %v377_v56, %v359_v54  ;;  %613 = vpow2.f32 %v536_v57  ;;  %v298_v8 = vsel %vm296_vm7, %v297_v6, %v295_v4 }
 0x224   : > { %v308_v9 = vadd.f32 1e-05, %v298_v8 }
 0x225   : > { %v537_v59 = vmul.f32 -1.442695, %v395_v58 }
 0x227   : > { %615 = vpow2.f32 %v537_v59 }
 0x22d   : > { %v614_v63 = vpop.eup %613 }
 0x22e   : > { %v410_v3 = vadd.f32 1.0, %v614_v63 }
 0x230   : > { %617 = vrcp.f32 %v410_v3 }
 0x231   : > { %v616_v61 = vpop.eup %615 }
 0x232   : > { %v411_v7 = vadd.f32 1.0, %v616_v61 }
 0x234   : > { %619 = vrcp.f32 %v411_v7 }
 0x235   : > { %621 = vrcp.f32 %v308_v9 }
 0x23a   : > { %v618_v10 = vpop.eup %617 }
 0x23b   : > { %v422_v11 = vmul.f32 %v618_v10, %v870_v0  ;;  %v348_v0 = vrot.slane %v922_v26, %v926_v41 }
 0x23d   : > { %426 = vst.msk [vmem:[%s937_s4] sm:$0x3] %vm187_vm0, %v422_v11 }
 0x23e   : > { %v620_v12 = vpop.eup %619 }
 0x23f   : > { %v423_v13 = vmul.f32 %v620_v12, %v874_v2  ;;  %v622_v14 = vpop.eup %621 }
 0x240   : > { %v320_v17 = vmul.f32 %v622_v14, %v904_v62 }
 0x241   : > { %427 = vst.msk [vmem:[%s937_s4 + $0x2] sm:$0x3] %vm187_vm0, %v423_v13 }
 0x242   : > { %v360_v20 = vmul.f32 %v348_v0, %v320_v17 }
 0x246   : > { %v273_v16 = vpop.xlane.xlu1 %272 }
 0x247   : > { %v277_v18 = vmul.f32 0.06666667, %v273_v16 }
 0x249   : > { %623 = vrsqrt.f32 %v277_v18  ;;  %vm301_vm8 = vcmp.eq.f32.partialorder %v277_v18, inf  ;;  %v304_v25 = vand.u32 2147483648, %v277_v18  ;;  %vm303_vm9 = vcmp.eq.f32.partialorder %v277_v18, 0.0 }
 0x24a   : > { %v380_v19 = vpop.permute.xlu1 %379 }
 0x24b   : > { %v385_v21 = vrot.slane %v380_v19, %v926_v41 }
 0x24d   : > { %v396_v22 = vadd.f32 %v385_v21, %v360_v20 }
 0x24e   : > { %v388_v31 = vpop.permute.xlu1 %387 }
 0x24f   : > { %v538_v23 = vmul.f32 -1.442695, %v396_v22  ;;  %v393_v35 = vrot.slane %v388_v31, %v926_v41 }
 0x251   : > { %625 = vpow2.f32 %v538_v23 }
 0x253   : > { %v624_v24 = vpop.eup %623 }
 0x254   : > { %v300_v2 = vmul.f32 %v624_v24, %v277_v18 }
 0x256   : > { %v302_v27 = vsel %vm301_vm8, %v277_v18, %v300_v2 }
 0x257   : > { %v305_v28 = vsel %vm303_vm9, %v304_v25, %v302_v27 }
 0x258   : > { %v309_v62 = vadd.f32 1e-05, %v305_v28 }
 0x25a   : > { %627 = vrcp.f32 %v309_v62 }
 0x25b   : > { %v626_v29 = vpop.eup %625 }
 0x25c   : > { %v412_v26 = vadd.f32 1.0, %v626_v29 }
 0x25e   : > { %629 = vrcp.f32 %v412_v26 }
 0x264   : > { %v628_v30 = vpop.eup %627 }
 0x265   : > { %v321_v33 = vmul.f32 %v628_v30, %v917_v15 }
 0x267   : > { %v361_v34 = vmul.f32 %v357_v32, %v321_v33 }
 0x268   : > { %v630_v36 = vpop.eup %629 }
 0x269   : > { %v424_v37 = vmul.f32 %v630_v36, %v872_v1  ;;  %v397_v39 = vadd.f32 %v393_v35, %v361_v34 }
 0x26b   : > { %v539_v40 = vmul.f32 -1.442695, %v397_v39  ;;  %428 = vst.msk [vmem:[%s937_s4 + $0x4] sm:$0x3] %vm187_vm0, %v424_v37 }
 0x26d   : > { %631 = vpow2.f32 %v539_v40 }
 0x277   : > { %v632_v42 = vpop.eup %631 }
 0x278   : > { %v413_v43 = vadd.f32 1.0, %v632_v42 }
 0x27a   : > { %633 = vrcp.f32 %v413_v43 }
 0x284   : > { %v634_v15 = vpop.eup %633 }
 0x285   : > { %v425_v1 = vmul.f32 %v634_v15, %v880_v5 }
 0x287   : > { %429 = vst.msk [vmem:[%s937_s4 + $0x6] sm:$0x3] %vm187_vm0, %v425_v1 }
 0x288   : > { %678 = shalt.err (!%p675_p4)
}
 0x289   : > { %s679_s26 = scalar_lea.hbm %s960_s17, 128  ;;  %s683_s6 = scalar_lea.hbm %s1011_s2, 256 }
 0x28a   : > { %p680_p5 = scmp.ne.s32.totalorder %s960_s17, %s679_s26  ;;  %p684_p1 = scmp.lt.u32.totalorder %s960_s17, %s1011_s2 }
 0x28b   : > { %p685_p3 = scmp.lt.u32.totalorder %s683_s6, %s679_s26  ;;  %p687_p11 = scmp.lt.u32.totalorder %s679_s26, %s960_s17 }
 0x28c   : > { %p681_p7 = pnand %p680_p5, %p1018_p12 }
 0x28d   : > { %p686_p6 = por %p685_p3, %p684_p1 }
 0x28e   : > { %p682_p9 = pneg %p681_p7 }
 0x28f   : > { %p688_p13 = por %p687_p11, %p686_p6 }
 0x291   : > { %p689_p8 = pnand %p688_p13, %p682_p9 }
 0x293   : > { %692 = shalt.err (!%p689_p8)
}
 0x294   : > { %s739_s30 = smov 32   ;;  %s740_s3 = smov 2  }
 0x295   : > { %549 = dma.vmem_to_hbm [thread:$0]  (%p1018_p12), %s962_s8, 128, %s960_s17, %s431_s19, %s739_s30, %s739_s30, %s740_s3  }
 0x296 PF: > { %s459_s4 = sand.u32 1, %s719_s9   ;;  %p1019_p10 = scmp.ne.s32.totalorder %s1016_s22, 0 }
 0x297   : > { %p1020_p0 = scmp.ge.s32.totalorder %s731_s12, 2  ;;  %s460_s7 = scalar_lea.sflag [#allocation4], %s459_s4 }
 0x299   : > { %p556_p2 = pnand %p1020_p0, %p1019_p10 }
 0x29b   : > { %714 = dma.done.wait (!%p556_p2), %s460_s7, 128  }
 0x29c   : > { %716 = vsyncadd (!%p556_p2), %s460_s7, 4294967168  ;;  %p15_p4 = scmp.ge.s32.totalorder %s781_s15, 4   ;;  %s1021_s9 = smov %s723_s10 }
 0x29d   : > { %s1022_s10 = smov %s727_s11  ;;  %s1023_s11 = smov %s793_s18 }
 0x29e   : > { %s1024_s12 = smov %s781_s15  ;;  %17 = sbr.rel (!%p15_p4) target bundleno = 5 (0x5), region = 76 }
 0x2a5   :  { %465 = vsyncpa [#allocation3], 1 }
 0x2a6   :  { %467 = vsyncpa [#allocation3 + $0x1], 1 }
 0x2a7   :  { %468 = vsyncpa [#allocation4], 1 }
 0x2a8   :  { %470 = vsyncpa [#allocation4 + $0x1], 1 }

</bundles_post_ra>
